<compile_context>
chip_gen: v6e
topology: v6e:2x2x1
jax: 0.10.0
libtpu: 0.0.40
codegen_flags: <defaults>
</compile_context>

<pallas_src>
import jax
import jax.numpy as jnp
from jax.experimental import pallas as pl
from jax.experimental.pallas import tpu as pltpu


def _conv_mm_kernel(p_ref, w_ref, b_ref, o_ref):
    """One (TILE_S, K) x (K, TILE_N) MXU matmul, bias fused, transposed store.

    p_ref: (1, TILE_S, K)   bf16 im2col patch rows for one batch image
    w_ref: (K, TILE_N)      bf16 flattened 3x3 taps
    b_ref: (1, TILE_N)      f32 bias slice
    o_ref: (1, TILE_N, TILE_S) f32 channel-major (NCHW-flat) output tile
    """
    acc = jnp.dot(p_ref[0], w_ref[...], preferred_element_type=jnp.float32)
    acc = acc + b_ref[...]
    # Fused NHWC->NCHW: store the tile channel-major (XLU transpose).
    o_ref[0] = jnp.transpose(acc).astype(o_ref.dtype)


def _pick_tile(dim, candidates):
    """Largest candidate divisor of dim; else the full dim (always a legal
    block because a block dim equal to the array dim is exempt from the
    (8,128) divisibility rule)."""
    for c in candidates:
        if dim % c == 0:
            return c
    return dim


def conv2d_sym(x_nchw, w_hwio, bias):
    """F.pad(mode='replicate', 1) + Conv2d(k=3, s=1, p=0) + Dropout(eval id).

    Returns the conv output in NCHW layout: (B, C_out, H, W), float32.
    """
    B, C_in, H, W = x_nchw.shape
    C_out = w_hwio.shape[-1]
    S = H * W
    K = 9 * C_in

    # --- im2col (wrapper side, bf16): replicate pad + 9 shifted slices ->
    #     (B, S, K) patch matrix, ordered (dy, dx, ci) to match HWIO weights.
    x_nhwc = jnp.transpose(x_nchw, (0, 2, 3, 1)).astype(jnp.bfloat16)
    x_pad = jnp.pad(x_nhwc, ((0, 0), (1, 1), (1, 1), (0, 0)), mode="edge")
    taps = [x_pad[:, dy:dy + H, dx:dx + W, :]
            for dy in range(3) for dx in range(3)]
    patches = jnp.stack(taps, axis=3).reshape(B, S, K)          # bf16
    w_mat = w_hwio.astype(jnp.bfloat16).reshape(K, C_out)       # bf16
    b2 = bias.astype(jnp.float32).reshape(1, C_out)             # f32

    # --- tiling: all three grid axes are independent output tiles ->
    #     "parallel" everywhere.  The batch axis keeps >= 2 parallel steps for
    #     v7x's 2 TCs even when one tile covers all of S / C_out.
    tile_s = _pick_tile(S, (1024, 512, 256, 128, 64, 32, 16, 8))
    tile_n = _pick_tile(C_out, (512, 256, 128))

    out = pl.pallas_call(
        _conv_mm_kernel,
        out_shape=jax.ShapeDtypeStruct((B, C_out, S), jnp.float32),
        grid=(B, S // tile_s, C_out // tile_n),
        in_specs=[
            pl.BlockSpec((1, tile_s, K), lambda b, i, j: (b, i, 0)),
            pl.BlockSpec((K, tile_n), lambda b, i, j: (0, j)),
            pl.BlockSpec((1, tile_n), lambda b, i, j: (0, j)),
        ],
        out_specs=pl.BlockSpec((1, tile_n, tile_s), lambda b, i, j: (b, j, i)),
        compiler_params=pltpu.CompilerParams(
            dimension_semantics=("parallel", "parallel", "parallel")),
    )(patches, w_mat, b2)

    # (B, C_out, S) in NHWC-row spatial order == NCHW; reshape is free.
    return out.reshape(B, C_out, H, W)


def phase_shift_ps(y_nchw, r, n_channel):
    """PS module: per-chunk buggy phase shift (raw torch .view, not a permute).

    Collapses the chunk/view/cat dance to one reshape + one 6-D transpose.
    """
    B, C, H, W = y_nchw.shape
    assert C == n_channel * r * r, "PS requires exactly r*r channels per chunk"
    x6 = y_nchw.reshape(B, n_channel, H, W, r, r)   # raw-memory reinterpretation
    x6 = jnp.transpose(x6, (0, 1, 2, 5, 3, 4))      # the single remaining copy
    return x6.reshape(B, n_channel, H * r, W * r)


def group_10_forward(x_nchw, w_hwio, bias, *, n_class, r=8):
    y_nchw = conv2d_sym(x_nchw, w_hwio, bias)
    return phase_shift_ps(y_nchw, r=r, n_channel=n_class * r)


def _ps_reference(x_nchw, r, n_channel):
    """Literal re-enactment of the PyTorch PS chunk/view/cat code (B >= 2)."""
    B, C, H, W = x_nchw.shape
    outs = []
    for chunk in jnp.split(x_nchw, n_channel, axis=1):
        X = chunk.reshape(B, H, W, r, r)            # torch .view
        X = jnp.swapaxes(X, 3, 4)                   # permute(0,1,2,4,3)
        X = jnp.concatenate([X[:, i] for i in range(H)], axis=2)  # (B,W,H*r,r)
        X = jnp.concatenate([X[:, j] for j in range(W)], axis=2)  # (B,H*r,W*r)
        outs.append(X[:, None])                     # unsqueeze + permute
    return jnp.concatenate(outs, axis=1)


if __name__ == "__main__":
    key = jax.random.PRNGKey(0)
    B, C_in, H, W = 2, 4, 16, 16
    n_class = 1
    r = 8
    n_channel = n_class * r            # 8 output channels after PS
    C_out = n_channel * r * r          # 512 conv channels (PS needs r*r per chunk)

    k1, k2, k3 = jax.random.split(key, 3)
    x = jax.random.normal(k1, (B, C_in, H, W), jnp.float32)
    w = jax.random.normal(k2, (3, 3, C_in, C_out), jnp.float32) * 0.05  # HWIO
    b = jax.random.normal(k3, (C_out,), jnp.float32) * 0.05

    fwd = jax.jit(lambda x_, w_, b_: group_10_forward(x_, w_, b_,
                                                      n_class=n_class, r=r))
    y = jax.block_until_ready(fwd(x, w, b))
    assert y.shape == (B, n_channel, H * r, W * r), y.shape

    # Cross-check the Pallas conv against XLA's conv on identical bf16
    # operands (f32 accumulation on both sides).
    x_bf_nhwc = jnp.transpose(x, (0, 2, 3, 1)).astype(jnp.bfloat16)
    x_pad_ref = jnp.pad(x_bf_nhwc, ((0, 0), (1, 1), (1, 1), (0, 0)), mode="edge")
    conv_ref_nhwc = jax.lax.conv_general_dilated(
        x_pad_ref, w.astype(jnp.bfloat16), window_strides=(1, 1),
        padding="VALID", dimension_numbers=("NHWC", "HWIO", "NHWC"),
        preferred_element_type=jnp.float32) + b
    conv_ref = jnp.transpose(conv_ref_nhwc, (0, 3, 1, 2))
    conv_pallas = conv2d_sym(x, w, b)
    max_err = float(jnp.max(jnp.abs(conv_pallas - conv_ref)))
    assert max_err < 1e-2, max_err

    # Cross-check the fast PS permutation against a literal torch-style PS.
    ps_fast = phase_shift_ps(conv_pallas, r=r, n_channel=n_channel)
    ps_ref = _ps_reference(conv_pallas, r=r, n_channel=n_channel)
    assert jnp.array_equal(ps_fast, ps_ref)
    assert jnp.allclose(y, ps_fast, atol=1e-5, rtol=1e-5)

    print("KERNEL_OK")
</pallas_src>

<mosaic_0001>
module attributes {stable_mosaic.version = 11 : i64} {
  func.func @_conv_mm_kernel(%arg0: i32, %arg1: i32, %arg2: i32, %arg3: memref<1x256x36xbf16, #tpu.memory_space<vmem>>, %arg4: memref<36x512xbf16, #tpu.memory_space<vmem>>, %arg5: memref<1x512xf32, #tpu.memory_space<vmem>>, %arg6: memref<1x512x256xf32, #tpu.memory_space<vmem>>) attributes {dimension_semantics = [#tpu.dimension_semantics<parallel>, #tpu.dimension_semantics<parallel>, #tpu.dimension_semantics<parallel>], iteration_bounds = array<i64: 2, 1, 1>, scalar_prefetch = 0 : i64, scratch_operands = 0 : i64, tpu.core_type = #tpu.core_type<tc>, window_params = [{transform_indices = @transform_0, window_bounds = array<i64: 1, 256, 36>}, {transform_indices = @transform_1, window_bounds = array<i64: 36, 512>}, {transform_indices = @transform_2, window_bounds = array<i64: 1, 512>}, {transform_indices = @transform_3, window_bounds = array<i64: 1, 512, 256>}]} {
    %c0 = arith.constant 0 : index
    %c0_0 = arith.constant 0 : index
    %c0_1 = arith.constant 0 : index
    %0 = vector.load %arg3[%c0, %c0_0, %c0_1] : memref<1x256x36xbf16, #tpu.memory_space<vmem>>, vector<1x256x36xbf16>
    %1 = vector.shape_cast %0 : vector<1x256x36xbf16> to vector<256x36xbf16>
    %c0_2 = arith.constant 0 : index
    %c0_3 = arith.constant 0 : index
    %2 = vector.load %arg4[%c0_2, %c0_3] : memref<36x512xbf16, #tpu.memory_space<vmem>>, vector<36x512xbf16>
    %cst = arith.constant dense<0.000000e+00> : vector<256x512xf32>
    %3 = tpu.matmul %1, %2, %cst {dimension_numbers = #tpu.dot_dimension_numbers<[1], [0], [0], [1], [0, 0, 1, 1], [], []>} : vector<256x36xbf16>, vector<36x512xbf16>, vector<256x512xf32> -> vector<256x512xf32>
    %c0_4 = arith.constant 0 : index
    %c0_5 = arith.constant 0 : index
    %4 = vector.load %arg5[%c0_4, %c0_5] : memref<1x512xf32, #tpu.memory_space<vmem>>, vector<1x512xf32>
    %5 = vector.broadcast %4 : vector<1x512xf32> to vector<256x512xf32>
    %6 = arith.addf %3, %5 : vector<256x512xf32>
    %7 = tpu.transpose %6, [1, 0] : vector<256x512xf32> -> vector<512x256xf32>
    %c0_6 = arith.constant 0 : index
    %c0_7 = arith.constant 0 : index
    %c0_8 = arith.constant 0 : index
    %8 = vector.load %arg6[%c0_6, %c0_7, %c0_8] : memref<1x512x256xf32, #tpu.memory_space<vmem>>, vector<1x512x256xf32>
    %9 = vector.shape_cast %8 : vector<1x512x256xf32> to vector<512x256xf32>
    %10 = vector.shape_cast %7 : vector<512x256xf32> to vector<1x512x256xf32>
    tpu.vector_store %arg6[%c0_6, %c0_7, %c0_8], %10 {strides = array<i32>} : memref<1x512x256xf32, #tpu.memory_space<vmem>>, vector<1x512x256xf32>,
    return
  }
  func.func @transform_0(%arg0: i32, %arg1: i32, %arg2: i32) -> (i32, i32, i32) {
    %c0_i32 = arith.constant 0 : i32
    %c0_i32_0 = arith.constant 0 : i32
    return %arg0, %arg1, %c0_i32 : i32, i32, i32
  }
  func.func @transform_1(%arg0: i32, %arg1: i32, %arg2: i32) -> (i32, i32) {
    %c0_i32 = arith.constant 0 : i32
    %c0_i32_0 = arith.constant 0 : i32
    return %c0_i32, %arg2 : i32, i32
  }
  func.func @transform_2(%arg0: i32, %arg1: i32, %arg2: i32) -> (i32, i32) {
    %c0_i32 = arith.constant 0 : i32
    %c0_i32_0 = arith.constant 0 : i32
    return %c0_i32, %arg2 : i32, i32
  }
  func.func @transform_3(%arg0: i32, %arg1: i32, %arg2: i32) -> (i32, i32, i32) {
    %c0_i32 = arith.constant 0 : i32
    return %arg0, %arg2, %arg1 : i32, i32, i32
  }
}

</mosaic_0001>

<bundles_post_ra>
// kernel: _lambda_.1
= control target key start
LH: loop header
LB: loop body
LE: loop exit
PB: predicated region body
PF: predicated region fallthrough
CT: control target
= control target key end

     0   :  { %8 = vsyncpa [#allocation3], 0  ;;  %s1661_s12 = smov 0   ;;  %s1663_s13 = smov 0   ;;  %s2259_s0 = inlined_call_operand.vmem [shape: bf16[2,256,36], index: 0, kind: input, shape index: {}]   ;;  %s2260_s1 = inlined_call_operand.vmem [shape: bf16[36,512], index: 1, kind: input, shape index: {}]   ;;  %s2261_s2 = inlined_call_operand.hbm [shape: f32[1,512], index: 2, kind: input, shape index: {}]   ;;  %s2262_s3 = inlined_call_operand.vmem [shape: f32[2,512,256], index: 3, kind: output, shape index: {}]  }
   0x1   :  { %s1665_s14 = smov 0  }
   0x2 LB: > { %s1439_s15 = sadd.s32 4294967295, %s1637_s14   ;;  %s33_s16 = sadd.s32 1, %s1633_s13  ;;  %s1637_s14 = sphi %s1665_s14, %s14_s14   ;;  %s1633_s13 = sphi %s1663_s13, %s2266_s13   ;;  %s1629_s12 = sphi %s1661_s12, %s2265_s12  }
   0x3   : > { %p35_p0 = scmp.ge.s32.totalorder %s33_s16, 2  ;;  %p1441_p1 = scmp.ge.s32.totalorder %s1637_s14, 1 }
   0x4   : > { %p148_p2 = scmp.lt.s32.totalorder %s1637_s14, 3  ;;  %p1686_p4 = scmp.eq.s32.totalorder %s1439_s15, 0 }
   0x5   : > { %s2268_s16 = smov (%p35_p0, %s33_s16), 0  ;;  %s1639_s19 = smov [#allocation2]  }
   0x6   : > { %p1682_p3 = pnand %p1441_p1, %p148_p2  ;;  %s173_s20 = sshll.u32 %s1639_s19, 4  ;;  %s174_s20 = int_to_ptr.vmem [resolvable:$true] %s173_s20 }
   0x7   : > { %s1596_s21 = scalar_lea.vmem %s174_s20, 64  ;;  %p1604_p11 = scmp.lt.s32.totalorder %s174_s20, %s174_s20 }
   0x8   : > { %p1521_p5 = pneg %p1682_p3  ;;  %p1597_p8 = scmp.ne.s32.totalorder %s174_s20, %s1596_s21 }
   0x9   : > { %p1605_p12 = scmp.lt.s32.totalorder %s1596_s21, %s1596_s21 }
   0xa   : > { %p1522_p6 = pnand %p1686_p4, %p1521_p5 }
   0xb   : > { %p1606_p13 = por %p1605_p12, %p1604_p11 }
   0xc   : > { %p1587_p7 = pneg %p1522_p6 }
   0xe   : > { %p1599_p9 = pnand %p1597_p8, %p1587_p7 }
  0x10   : > { %p1600_p10 = pneg %p1599_p9 }
  0x12   : > { %p1607_p0 = pnand %p1606_p13, %p1600_p10 }
  0x14   : > { %1610 = shalt.err (!%p1607_p0)
}
  0x15   : > { %1524 = dma.hbm_to_vmem [thread:$0]  (!%p1522_p6), %s2261_s2, 64, %s174_s20, [#allocation3]  }
  0x16   : > { %199 = sbr.rel (%p1682_p3) target bundleno = 618 (0x26a), region = 32 }
  0x1b   : > { %1624 = dma.done.wait (%p1686_p4), [#allocation3], 64  }
  0x1c   : > { %1626 = vsyncadd (%p1686_p4), [#allocation3], 4294967232  ;;  %p242_p1 = scmp.lt.s32.totalorder %s1629_s12, 1  ;;  %v1640_v0 = vmov 0   ;;  %v315_v1 = vld [vmem:[%s2260_s1 + $0x40] sm:$0x33]  ;;  %v319_v33 = vlaneseq }
  0x1d   : > { %563 = vmatprep.mubr.bf16.mxu0 %v1640_v0  ;;  %756 = vmatprep.mubr.bf16.mxu1 %v1640_v0  ;;  %vm518_vm0 = vcmask 1041408   ;;  %v1476_v2 = vcombine.high %v315_v1, %v315_v1  ;;  %v1475_v3 = vcombine.low %v315_v1, %v315_v1  ;;  %v1555_v4 = vld [vmem:[%s2260_s1 + $0x24] ss:$16 sps:$4 sm:$0xff]   ;;  %v1557_v6 = vld [vmem:[%s2260_s1 + $0x20] ss:$16 sps:$4 sm:$0xff]   ;;  %vm469_vm1 = vcmask 293888  }
  0x1e   : > { %s2270_s12 = smov (!%p242_p1, %s1629_s12), 1  ;;  %v1558_v7 = vld [vmem:[%s2260_s1 + $0x4] ss:$16 sps:$4 sm:$0xff]   ;;  %v1560_v8 = vld [vmem:[%s2260_s1] ss:$16 sps:$4 sm:$0xff]   ;;  %v320_v34 = vshrl.u32 %v319_v33, 7 }
  0x1f   : > { %s1515_s24 = sshll.u32 %s2270_s12, 7  ;;  %1479 = vmatprep.subr.msk.bf16.mxu0 %vm518_vm0, %v1476_v2  ;;  %v520_v5 = vsel %vm518_vm0, %v1475_v3, 0  ;;  %v316_v9 = vld [vmem:[%s2260_s1 + $0x48] sm:$0x33]  ;;  %v317_v36 = vld [vmem:[#allocation2] sm:$0xf] }
  0x20   : > { %s1719_s4 = scalar_lea.vmem %s2259_s0, %s1515_s24  ;;  %542 = vmatpush1.bf16.msra.mxu0 %v520_v5  ;;  %v1478_v10 = vcombine.high %v316_v9, %v316_v9  ;;  %v1477_v11 = vcombine.low %v316_v9, %v316_v9  ;;  %v1570_v13 = vld [vmem:[%s2260_s1 + $0x2c] ss:$16 sps:$4 sm:$0xff]   ;;  %v1572_v15 = vld [vmem:[%s2260_s1 + $0x28] ss:$16 sps:$4 sm:$0xff]   ;;  %v329_v35 = vsub.s32 2, %v320_v34  ;;  %v333_v38 = vsub.s32 3, %v320_v34 }
  0x21   : > { %543 = vmatprep.subr.bf16.mxu0 %v1555_v4  ;;  %v1561_v12 = vld [vmem:[%s1719_s4] sm:$0xff]   ;;  %v1573_v16 = vld [vmem:[%s2260_s1 + $0xc] ss:$16 sps:$4 sm:$0xff]   ;;  %v1575_v17 = vld [vmem:[%s2260_s1 + $0x8] ss:$16 sps:$4 sm:$0xff]   ;;  %v321_v40 = vsub.s32 0, %v320_v34 }
  0x22   : > { %1496 = vmatprep.subr.msk.bf16.mxu1 %vm518_vm0, %v1478_v10  ;;  %v526_v14 = vsel %vm518_vm0, %v1477_v11, 0  ;;  %v1562_v18 = vld [vmem:[%s1719_s4 + $0x8] sm:$0xff]   ;;  %v1563_v19 = vld [vmem:[%s1719_s4 + $0x10] sm:$0xff]   ;;  %v1564_v20 = vld [vmem:[%s1719_s4 + $0x18] sm:$0xff]   ;;  %v1826_v37 = vrot.slane %v317_v36, %v329_v35  ;;  %v1828_v39 = vrot.slane %v317_v36, %v333_v38  ;;  %v325_v41 = vsub.s32 1, %v320_v34  ;;  %s1516_s25 = sshll.u32 %s2270_s12, 10 }
  0x23   : > { %735 = vmatpush1.bf16.msra.mxu1 %v526_v14  ;;  %v1565_v21 = vld [vmem:[%s1719_s4 + $0x20] sm:$0xff]   ;;  %v1566_v22 = vld [vmem:[%s1719_s4 + $0x28] sm:$0xff]   ;;  %v1569_v23 = vld [vmem:[%s1719_s4 + $0x30] sm:$0xff]   ;;  %v1831_v42 = vrot.slane %v317_v36, %v321_v40  ;;  %s1969_s28 = scalar_lea.vmem %s2262_s3, %s1516_s25 }
  0x24   : > { %544 = vmatpush1.bf16.msra.mxu0 %v1557_v6  ;;  %736 = vmatprep.subr.bf16.mxu1 %v1570_v13  ;;  %v1576_v24 = vld [vmem:[%s1719_s4 + $0x38] sm:$0xff]   ;;  %v1577_v25 = vld [vmem:[%s1719_s4 + $0x40] sm:$0xff]   ;;  %v1578_v26 = vld [vmem:[%s1719_s4 + $0x48] sm:$0xff]   ;;  %v1833_v43 = vrot.slane %v317_v36, %v325_v41 }
  0x25   : > { %545 = vmatprep.subr.bf16.mxu0 %v1558_v7  ;;  %v1579_v27 = vld [vmem:[%s1719_s4 + $0x50] sm:$0xff]   ;;  %v1580_v28 = vld [vmem:[%s1719_s4 + $0x58] sm:$0xff]   ;;  %v1581_v29 = vld [vmem:[%s1719_s4 + $0x60] sm:$0xff]  }
  0x26   : > { %v1582_v30 = vld [vmem:[%s1719_s4 + $0x68] sm:$0xff]   ;;  %v1583_v31 = vld [vmem:[%s1719_s4 + $0x70] sm:$0xff]   ;;  %v1584_v32 = vld [vmem:[%s1719_s4 + $0x78] sm:$0xff]  }
  0x27   : > { %737 = vmatpush1.bf16.msra.mxu1 %v1572_v15 }
  0x28   : > { %546 = vmatpush1.bf16.msra.mxu0 %v1560_v8  ;;  %738 = vmatprep.subr.bf16.mxu1 %v1573_v16 }
  0x2b   : > { %1480 = vmatmul.mubr.msk.bf16.vlgmr.msra.gmra.mxu0 %vm469_vm1, %v1561_v12  ;;  %739 = vmatpush1.bf16.msra.mxu1 %v1575_v17 }
  0x2c   : > { %573 = vmatprep.mubr.bf16.mxu0 %v1640_v0 }
  0x2e   : > { %1497 = vmatmul.mubr.msk.bf16.vlgmr.msra.gmra.mxu1 %vm469_vm1, %v1561_v12 }
  0x2f   : > { %766 = vmatprep.mubr.bf16.mxu1 %v1640_v0 }
  0x33   : > { %1481 = vmatmul.mubr.msk.bf16.gmra.mxu0 %vm469_vm1, %v1562_v18 }
  0x34   : > { %583 = vmatprep.mubr.bf16.mxu0 %v1640_v0 }
  0x36   : > { %1498 = vmatmul.mubr.msk.bf16.gmra.mxu1 %vm469_vm1, %v1562_v18 }
  0x37   : > { %776 = vmatprep.mubr.bf16.mxu1 %v1640_v0 }
  0x3b   : > { %1482 = vmatmul.mubr.msk.bf16.gmra.mxu0 %vm469_vm1, %v1563_v19 }
  0x3c   : > { %593 = vmatprep.mubr.bf16.mxu0 %v1640_v0 }
  0x3e   : > { %1499 = vmatmul.mubr.msk.bf16.gmra.mxu1 %vm469_vm1, %v1563_v19 }
  0x3f   : > { %786 = vmatprep.mubr.bf16.mxu1 %v1640_v0 }
  0x43   : > { %1483 = vmatmul.mubr.msk.bf16.gmra.mxu0 %vm469_vm1, %v1564_v20 }
  0x44   : > { %603 = vmatprep.mubr.bf16.mxu0 %v1640_v0 }
  0x46   : > { %1500 = vmatmul.mubr.msk.bf16.gmra.mxu1 %vm469_vm1, %v1564_v20 }
  0x47   : > { %796 = vmatprep.mubr.bf16.mxu1 %v1640_v0 }
  0x4b   : > { %1484 = vmatmul.mubr.msk.bf16.gmra.mxu0 %vm469_vm1, %v1565_v21 }
  0x4c   : > { %613 = vmatprep.mubr.bf16.mxu0 %v1640_v0 }
  0x4e   : > { %1501 = vmatmul.mubr.msk.bf16.gmra.mxu1 %vm469_vm1, %v1565_v21 }
  0x4f   : > { %806 = vmatprep.mubr.bf16.mxu1 %v1640_v0 }
  0x53   : > { %1485 = vmatmul.mubr.msk.bf16.gmra.mxu0 %vm469_vm1, %v1566_v22 }
  0x54   : > { %623 = vmatprep.mubr.bf16.mxu0 %v1640_v0 }
  0x56   : > { %1502 = vmatmul.mubr.msk.bf16.gmra.mxu1 %vm469_vm1, %v1566_v22 }
  0x57   : > { %816 = vmatprep.mubr.bf16.mxu1 %v1640_v0 }
  0x5b   : > { %1486 = vmatmul.mubr.msk.bf16.gmra.mxu0 %vm469_vm1, %v1569_v23 }
  0x5c   : > { %633 = vmatprep.mubr.bf16.mxu0 %v1640_v0 }
  0x5e   : > { %1503 = vmatmul.mubr.msk.bf16.gmra.mxu1 %vm469_vm1, %v1569_v23 }
  0x5f   : > { %826 = vmatprep.mubr.bf16.mxu1 %v1640_v0 }
  0x63   : > { %1487 = vmatmul.mubr.msk.bf16.gmra.mxu0 %vm469_vm1, %v1576_v24 }
  0x64   : > { %643 = vmatprep.mubr.bf16.mxu0 %v1640_v0 }
  0x66   : > { %1504 = vmatmul.mubr.msk.bf16.gmra.mxu1 %vm469_vm1, %v1576_v24 }
  0x67   : > { %836 = vmatprep.mubr.bf16.mxu1 %v1640_v0 }
  0x6b   : > { %1488 = vmatmul.mubr.msk.bf16.gmra.mxu0 %vm469_vm1, %v1577_v25 }
  0x6c   : > { %653 = vmatprep.mubr.bf16.mxu0 %v1640_v0 }
  0x6e   : > { %1505 = vmatmul.mubr.msk.bf16.gmra.mxu1 %vm469_vm1, %v1577_v25 }
  0x6f   : > { %846 = vmatprep.mubr.bf16.mxu1 %v1640_v0 }
  0x73   : > { %1489 = vmatmul.mubr.msk.bf16.gmra.mxu0 %vm469_vm1, %v1578_v26 }
  0x74   : > { %663 = vmatprep.mubr.bf16.mxu0 %v1640_v0 }
  0x76   : > { %1506 = vmatmul.mubr.msk.bf16.gmra.mxu1 %vm469_vm1, %v1578_v26 }
  0x77   : > { %856 = vmatprep.mubr.bf16.mxu1 %v1640_v0 }
  0x7b   : > { %1490 = vmatmul.mubr.msk.bf16.gmra.mxu0 %vm469_vm1, %v1579_v27 }
  0x7c   : > { %673 = vmatprep.mubr.bf16.mxu0 %v1640_v0 }
  0x7e   : > { %1507 = vmatmul.mubr.msk.bf16.gmra.mxu1 %vm469_vm1, %v1579_v27 }
  0x7f   : > { %866 = vmatprep.mubr.bf16.mxu1 %v1640_v0 }
  0x83   : > { %1491 = vmatmul.mubr.msk.bf16.gmra.mxu0 %vm469_vm1, %v1580_v28 }
  0x84   : > { %683 = vmatprep.mubr.bf16.mxu0 %v1640_v0 }
  0x86   : > { %1508 = vmatmul.mubr.msk.bf16.gmra.mxu1 %vm469_vm1, %v1580_v28 }
  0x87   : > { %876 = vmatprep.mubr.bf16.mxu1 %v1640_v0 }
  0x8b   : > { %1492 = vmatmul.mubr.msk.bf16.gmra.mxu0 %vm469_vm1, %v1581_v29 }
  0x8c   : > { %693 = vmatprep.mubr.bf16.mxu0 %v1640_v0 }
  0x8e   : > { %1509 = vmatmul.mubr.msk.bf16.gmra.mxu1 %vm469_vm1, %v1581_v29 }
  0x8f   : > { %886 = vmatprep.mubr.bf16.mxu1 %v1640_v0 }
  0x93   : > { %1493 = vmatmul.mubr.msk.bf16.gmra.mxu0 %vm469_vm1, %v1582_v30 }
  0x94   : > { %703 = vmatprep.mubr.bf16.mxu0 %v1640_v0 }
  0x96   : > { %1510 = vmatmul.mubr.msk.bf16.gmra.mxu1 %vm469_vm1, %v1582_v30 }
  0x97   : > { %896 = vmatprep.mubr.bf16.mxu1 %v1640_v0 }
  0x9b   : > { %1494 = vmatmul.mubr.msk.bf16.gmra.mxu0 %vm469_vm1, %v1583_v31 }
  0x9c   : > { %713 = vmatprep.mubr.bf16.mxu0 %v1640_v0 }
  0x9e   : > { %1511 = vmatmul.mubr.msk.bf16.gmra.mxu1 %vm469_vm1, %v1583_v31 }
  0x9f   : > { %906 = vmatprep.mubr.bf16.mxu1 %v1640_v0 }
  0xa3   : > { %1495 = vmatmul.mubr.msk.bf16.gmra.mxu0 %vm469_vm1, %v1584_v32 }
  0xa6   : > { %1512 = vmatmul.mubr.msk.bf16.gmra.mxu1 %vm469_vm1, %v1584_v32 }
  0xeb   : > { %v565_v44 = vpop.f32.mrf.mxu0 }
  0xec   : > { %v566_v45 = vadd.f32 %v565_v44, %v1831_v42 }
  0xed   : > { %v567_v46 = vpop.f32.mrf.mxu0 }
  0xee   : > { %917 = vxpose.xlu0.b32.start [1/16] %v566_v45, 128  ;;  %v568_v47 = vadd.f32 %v567_v46, %v1833_v43  ;;  %v1840_v54 = vpop.f32.mrf.mxu1 }
  0xef   : > { %v569_v48 = vpop.f32.mrf.mxu0 }
  0xf0   : > { %v570_v49 = vadd.f32 %v569_v48, %v1831_v42  ;;  %949 = vxpose.xlu1.b32.start [1/16] %v568_v47, 128  ;;  %v1843_v57 = vpop.f32.mrf.mxu1 }
  0xf1   : > { %v571_v50 = vpop.f32.mrf.mxu0 }
  0xf2   : > { %v572_v51 = vadd.f32 %v571_v50, %v1833_v43  ;;  %918 = vxpose.xlu0.b32.cont [2/16] %v570_v49, 128  ;;  %v1846_v60 = vpop.f32.mrf.mxu1 }
  0xf3   : > { %v575_v52 = vpop.f32.mrf.mxu0 }
  0xf4   : > { %v576_v53 = vadd.f32 %v575_v52, %v1831_v42  ;;  %950 = vxpose.xlu1.b32.cont [2/16] %v572_v51, 128  ;;  %v1849_v63 = vpop.f32.mrf.mxu1 }
  0xf5   : > { %v577_v55 = vpop.f32.mrf.mxu0 }
  0xf6   : > { %v578_v56 = vadd.f32 %v577_v55, %v1833_v43  ;;  %919 = vxpose.xlu0.b32.cont [3/16] %v576_v53, 128  ;;  %v1852_v2 = vpop.f32.mrf.mxu1 }
  0xf7   : > { %v579_v58 = vpop.f32.mrf.mxu0 }
  0xf8   : > { %v580_v59 = vadd.f32 %v579_v58, %v1831_v42  ;;  %951 = vxpose.xlu1.b32.cont [3/16] %v578_v56, 128  ;;  %v1855_v6 = vpop.f32.mrf.mxu1 }
  0xf9   : > { %v581_v61 = vpop.f32.mrf.mxu0 }
  0xfa   : > { %v582_v62 = vadd.f32 %v581_v61, %v1833_v43  ;;  %920 = vxpose.xlu0.b32.cont [4/16] %v580_v59, 128  ;;  %v1859_v11 = vpop.f32.mrf.mxu1 }
  0xfb   : > { %v585_v0 = vpop.f32.mrf.mxu0 }
  0xfc   : > { %v586_v1 = vadd.f32 %v585_v0, %v1831_v42  ;;  %952 = vxpose.xlu1.b32.cont [4/16] %v582_v62, 128  ;;  %v1863_v16 = vpop.f32.mrf.mxu1 }
  0xfd   : > { %v587_v3 = vpop.f32.mrf.mxu0 }
  0xfe   : > { %v588_v4 = vadd.f32 %v587_v3, %v1833_v43  ;;  %921 = vxpose.xlu0.b32.cont [5/16] %v586_v1, 128  ;;  %v1867_v21 = vpop.f32.mrf.mxu1 }
  0xff   : > { %v589_v5 = vpop.f32.mrf.mxu0 }
 0x100   : > { %v590_v7 = vadd.f32 %v589_v5, %v1831_v42  ;;  %953 = vxpose.xlu1.b32.cont [5/16] %v588_v4, 128  ;;  %v1871_v26 = vpop.f32.mrf.mxu1  ;;  %v759_v4 = vadd.f32 %v1840_v54, %v1826_v37  ;;  %v765_v54 = vadd.f32 %v1849_v63, %v1828_v39  ;;  %v775_v63 = vadd.f32 %v1863_v16, %v1828_v39 }
 0x101   : > { %v591_v8 = vpop.f32.mrf.mxu0 }
 0x102   : > { %v592_v9 = vadd.f32 %v591_v8, %v1833_v43  ;;  %922 = vxpose.xlu0.b32.cont [6/16] %v590_v7, 128  ;;  %v1875_v31 = vpop.f32.mrf.mxu1 }
 0x103   : > { %v595_v10 = vpop.f32.mrf.mxu0 }
 0x104   : > { %v596_v12 = vadd.f32 %v595_v10, %v1831_v42  ;;  %954 = vxpose.xlu1.b32.cont [6/16] %v592_v9, 128  ;;  %v1879_v36 = vpop.f32.mrf.mxu1  ;;  %v761_v9 = vadd.f32 %v1843_v57, %v1828_v39  ;;  %v771_v57 = vadd.f32 %v1855_v6, %v1828_v39  ;;  %v781_v6 = vadd.f32 %v1871_v26, %v1828_v39 }
 0x105   : > { %v597_v13 = vpop.f32.mrf.mxu0  ;;  %v785_v16 = vadd.f32 %v1879_v36, %v1828_v39 }
 0x106   : > { %v598_v14 = vadd.f32 %v597_v13, %v1833_v43  ;;  %923 = vxpose.xlu0.b32.cont [7/16] %v596_v12, 128  ;;  %v788_v45 = vpop.f32.mrf.mxu1  ;;  %v763_v13 = vadd.f32 %v1846_v60, %v1826_v37  ;;  %v773_v60 = vadd.f32 %v1859_v11, %v1826_v37  ;;  %v783_v11 = vadd.f32 %v1875_v31, %v1826_v37 }
 0x107   : > { %v599_v15 = vpop.f32.mrf.mxu0 }
 0x108   : > { %v600_v17 = vadd.f32 %v599_v15, %v1831_v42  ;;  %955 = vxpose.xlu1.b32.cont [7/16] %v598_v14, 128  ;;  %v790_v50 = vpop.f32.mrf.mxu1  ;;  %v769_v14 = vadd.f32 %v1852_v2, %v1826_v37  ;;  %v779_v2 = vadd.f32 %v1867_v21, %v1826_v37  ;;  %v789_v21 = vadd.f32 %v788_v45, %v1826_v37 }
 0x109   : > { %v601_v18 = vpop.f32.mrf.mxu0  ;;  %v791_v26 = vadd.f32 %v790_v50, %v1828_v39 }
 0x10a   : > { %v602_v19 = vadd.f32 %v601_v18, %v1833_v43  ;;  %924 = vxpose.xlu0.b32.cont [8/16] %v600_v17, 128  ;;  %v792_v56 = vpop.f32.mrf.mxu1 }
 0x10b   : > { %v605_v20 = vpop.f32.mrf.mxu0 }
 0x10c   : > { %v606_v22 = vadd.f32 %v605_v20, %v1831_v42  ;;  %956 = vxpose.xlu1.b32.cont [8/16] %v602_v19, 128  ;;  %v794_v0 = vpop.f32.mrf.mxu1 }
 0x10d   : > { %v607_v23 = vpop.f32.mrf.mxu0  ;;  %v795_v31 = vadd.f32 %v794_v0, %v1828_v39 }
 0x10e   : > { %v608_v24 = vadd.f32 %v607_v23, %v1833_v43  ;;  %925 = vxpose.xlu0.b32.cont [9/16] %v606_v22, 128  ;;  %v798_v7 = vpop.f32.mrf.mxu1 }
 0x10f   : > { %v609_v25 = vpop.f32.mrf.mxu0 }
 0x110   : > { %v610_v27 = vadd.f32 %v609_v25, %v1831_v42  ;;  %957 = vxpose.xlu1.b32.cont [9/16] %v608_v24, 128  ;;  %v800_v10 = vpop.f32.mrf.mxu1 }
 0x111   : > { %v611_v28 = vpop.f32.mrf.mxu0 }
 0x112   : > { %v612_v29 = vadd.f32 %v611_v28, %v1833_v43  ;;  %926 = vxpose.xlu0.b32.cont [10/16] %v610_v27, 128  ;;  %v802_v15 = vpop.f32.mrf.mxu1 }
 0x113   : > { %v615_v30 = vpop.f32.mrf.mxu0 }
 0x114   : > { %v616_v32 = vadd.f32 %v615_v30, %v1831_v42  ;;  %958 = vxpose.xlu1.b32.cont [10/16] %v612_v29, 128  ;;  %v804_v18 = vpop.f32.mrf.mxu1  ;;  %v793_v30 = vadd.f32 %v792_v56, %v1826_v37 }
 0x115   : > { %v617_v33 = vpop.f32.mrf.mxu0 }
 0x116   : > { %v618_v34 = vadd.f32 %v617_v33, %v1833_v43  ;;  %927 = vxpose.xlu0.b32.cont [11/16] %v616_v32, 128  ;;  %v808_v20 = vpop.f32.mrf.mxu1  ;;  %v799_v32 = vadd.f32 %v798_v7, %v1826_v37 }
 0x117   : > { %v619_v35 = vpop.f32.mrf.mxu0 }
 0x118   : > { %v620_v38 = vadd.f32 %v619_v35, %v1831_v42  ;;  %959 = vxpose.xlu1.b32.cont [11/16] %v618_v34, 128  ;;  %v810_v23 = vpop.f32.mrf.mxu1  ;;  %v801_v35 = vadd.f32 %v800_v10, %v1828_v39 }
 0x119   : > { %v621_v40 = vpop.f32.mrf.mxu0 }
 0x11a   : > { %v622_v41 = vadd.f32 %v621_v40, %v1833_v43  ;;  %928 = vxpose.xlu0.b32.cont [12/16] %v620_v38, 128  ;;  %v812_v25 = vpop.f32.mrf.mxu1  ;;  %v803_v40 = vadd.f32 %v802_v15, %v1826_v37 }
 0x11b   : > { %v625_v44 = vpop.f32.mrf.mxu0  ;;  %v813_v50 = vadd.f32 %v812_v25, %v1826_v37 }
 0x11c   : > { %v626_v46 = vadd.f32 %v625_v44, %v1831_v42  ;;  %960 = vxpose.xlu1.b32.cont [12/16] %v622_v41, 128  ;;  %v814_v28 = vpop.f32.mrf.mxu1  ;;  %v805_v41 = vadd.f32 %v804_v18, %v1828_v39  ;;  %v809_v44 = vadd.f32 %v808_v20, %v1826_v37 }
 0x11d   : > { %v627_v47 = vpop.f32.mrf.mxu0 }
 0x11e   : > { %v628_v48 = vadd.f32 %v627_v47, %v1833_v43  ;;  %929 = vxpose.xlu0.b32.cont [13/16] %v626_v46, 128  ;;  %v818_v33 = vpop.f32.mrf.mxu1  ;;  %v811_v47 = vadd.f32 %v810_v23, %v1828_v39 }
 0x11f   : > { %v629_v49 = vpop.f32.mrf.mxu0 }
 0x120   : > { %v630_v51 = vadd.f32 %v629_v49, %v1831_v42  ;;  %961 = vxpose.xlu1.b32.cont [13/16] %v628_v48, 128  ;;  %v820_v36 = vpop.f32.mrf.mxu1 }
 0x121   : > { %v631_v52 = vpop.f32.mrf.mxu0  ;;  %v821_v56 = vadd.f32 %v820_v36, %v1828_v39 }
 0x122   : > { %v632_v53 = vadd.f32 %v631_v52, %v1833_v43  ;;  %930 = vxpose.xlu0.b32.cont [14/16] %v630_v51, 128  ;;  %v822_v45 = vpop.f32.mrf.mxu1  ;;  %v815_v51 = vadd.f32 %v814_v28, %v1828_v39  ;;  %v819_v52 = vadd.f32 %v818_v33, %v1826_v37 }
 0x123   : > { %v635_v55 = vpop.f32.mrf.mxu0 }
 0x124   : > { %v636_v58 = vadd.f32 %v635_v55, %v1831_v42  ;;  %962 = vxpose.xlu1.b32.cont [14/16] %v632_v53, 128  ;;  %v824_v48 = vpop.f32.mrf.mxu1 }
 0x125   : > { %v637_v59 = vpop.f32.mrf.mxu0 }
 0x126   : > { %v638_v61 = vadd.f32 %v637_v59, %v1833_v43  ;;  %931 = vxpose.xlu0.b32.cont [15/16] %v636_v58, 128  ;;  %v828_v53 = vpop.f32.mrf.mxu1 }
 0x127   : > { %v639_v62 = vpop.f32.mrf.mxu0  ;;  %v829_v0 = vadd.f32 %v828_v53, %v1826_v37 }
 0x128   : > { %v640_v1 = vadd.f32 %v639_v62, %v1831_v42  ;;  %963 = vxpose.xlu1.b32.cont [15/16] %v638_v61, 128  ;;  %v830_v58 = vpop.f32.mrf.mxu1  ;;  %v823_v61 = vadd.f32 %v822_v45, %v1826_v37  ;;  %v825_v62 = vadd.f32 %v824_v48, %v1828_v39 }
 0x129   : > { %v641_v3 = vpop.f32.mrf.mxu0 }
 0x12a   : > { %v642_v5 = vadd.f32 %v641_v3, %v1833_v43  ;;  %932 = vxpose.xlu0.b32.end [16/16] %v640_v1, 128  ;;  %v832_v1 = vpop.f32.mrf.mxu1 }
 0x12b   : > { %v1893_v8 = vpop.f32.mrf.mxu0 }
 0x12c   : > { %964 = vxpose.xlu1.b32.end [16/16] %v642_v5, 128  ;;  %v834_v5 = vpop.f32.mrf.mxu1 }
 0x12d   : > { %v1897_v12 = vpop.f32.mrf.mxu0  ;;  %v835_v10 = vadd.f32 %v834_v5, %v1828_v39 }
 0x12e   : > { %981 = vxpose.xlu0.b32.start [1/16] %v759_v4, 128  ;;  %v831_v4 = vadd.f32 %v830_v58, %v1828_v39  ;;  %v1978_v15 = vpop.f32.mrf.mxu1  ;;  %v648_v18 = vadd.f32 %v1897_v12, %v1833_v43 }
 0x12f   : > { %v1905_v17 = vpop.f32.mrf.mxu0 }
 0x130   : > { %1013 = vxpose.xlu1.b32.start [1/16] %v761_v9, 128  ;;  %v833_v9 = vadd.f32 %v832_v1, %v1826_v37 }
 0x131   : > { %v1909_v19 = vpop.f32.mrf.mxu0 }
 0x132   : > { %982 = vxpose.xlu0.b32.cont [2/16] %v763_v13, 128  ;;  %v646_v13 = vadd.f32 %v1893_v8, %v1831_v42 }
 0x133   : > { %v1917_v22 = vpop.f32.mrf.mxu0 }
 0x134   : > { %1014 = vxpose.xlu1.b32.cont [2/16] %v765_v54, 128  ;;  %v656_v12 = vadd.f32 %v1917_v22, %v1831_v42 }
 0x135   : > { %v1921_v24 = vpop.f32.mrf.mxu0 }
 0x136   : > { %983 = vxpose.xlu0.b32.cont [3/16] %v769_v14, 128 }
 0x137   : > { %v1928_v27 = vpop.f32.mrf.mxu0 }
 0x138   : > { %1015 = vxpose.xlu1.b32.cont [3/16] %v771_v57, 128 }
 0x139   : > { %v1931_v29 = vpop.f32.mrf.mxu0 }
 0x13a   : > { %984 = vxpose.xlu0.b32.cont [4/16] %v773_v60, 128 }
 0x13b   : > { %v1936_v34 = vpop.f32.mrf.mxu0 }
 0x13c   : > { %1016 = vxpose.xlu1.b32.cont [4/16] %v775_v63, 128  ;;  %v1986_v63 = vpop.f32.mrf.mxu1 }
 0x13d   : > { %v1939_v38 = vpop.f32.mrf.mxu0 }
 0x13e   : > { %985 = vxpose.xlu0.b32.cont [5/16] %v779_v2, 128  ;;  %v650_v2 = vadd.f32 %v1905_v17, %v1831_v42 }
 0x13f   : > { %v1944_v46 = vpop.f32.mrf.mxu0 }
 0x140   : > { %1017 = vxpose.xlu1.b32.cont [5/16] %v781_v6, 128  ;;  %v652_v6 = vadd.f32 %v1909_v19, %v1833_v43 }
 0x141   : > { %v1947_v49 = vpop.f32.mrf.mxu0 }
 0x142   : > { %986 = vxpose.xlu0.b32.cont [6/16] %v783_v11, 128 }
 0x143   : > { %v1952_v55 = vpop.f32.mrf.mxu0 }
 0x144   : > { %1018 = vxpose.xlu1.b32.cont [6/16] %v785_v16, 128  ;;  %v1998_v16 = vpop.f32.mrf.mxu1 }
 0x145   : > { %v1955_v59 = vpop.f32.mrf.mxu0 }
 0x146   : > { %987 = vxpose.xlu0.b32.cont [7/16] %v789_v21, 128  ;;  %v658_v21 = vadd.f32 %v1921_v24, %v1833_v43  ;;  %v2006_v25 = vpop.f32.mrf.mxu1  ;;  %v666_v24 = vadd.f32 %v1936_v34, %v1831_v42 }
 0x147   : > { %v1960_v3 = vpop.f32.mrf.mxu0 }
 0x148   : > { %1019 = vxpose.xlu1.b32.cont [7/16] %v791_v26, 128  ;;  %v660_v26 = vadd.f32 %v1928_v27, %v1831_v42  ;;  %v2016_v33 = vpop.f32.mrf.mxu1  ;;  %v668_v27 = vadd.f32 %v1939_v38, %v1833_v43  ;;  %v676_v38 = vadd.f32 %v1952_v55, %v1831_v42  ;;  %v680_v53 = vadd.f32 %v1960_v3, %v1831_v42 }
 0x149   : > { %v1964_v7 = vpop.f32.mrf.mxu0 }
 0x14a   : > { %988 = vxpose.xlu0.b32.cont [8/16] %v793_v30, 128  ;;  %v662_v30 = vadd.f32 %v1931_v29, %v1833_v43  ;;  %v2022_v34 = vpop.f32.mrf.mxu1 }
 0x14b   : > { %v1976_v14 = vpop.f32.mrf.mxu0 }
 0x14c   : > { %1020 = vxpose.xlu1.b32.cont [8/16] %v795_v31, 128  ;;  %v2032_v48 = vpop.f32.mrf.mxu1  ;;  %v686_v58 = vadd.f32 %v1976_v14, %v1831_v42 }
 0x14d   : > { %v1984_v8 = vpop.f32.mrf.mxu0 }
 0x14e   : > { %989 = vxpose.xlu0.b32.cont [9/16] %v799_v32, 128  ;;  %v688_v1 = vadd.f32 %v1984_v8, %v1833_v43 }
 0x14f   : > { %v1996_v11 = vpop.f32.mrf.mxu0 }
 0x150   : > { %1021 = vxpose.xlu1.b32.cont [9/16] %v801_v35, 128 }
 0x151   : > { %v2004_v22 = vpop.f32.mrf.mxu0 }
 0x152   : > { %990 = vxpose.xlu0.b32.cont [10/16] %v803_v40, 128  ;;  %v670_v40 = vadd.f32 %v1944_v46, %v1831_v42  ;;  %v678_v46 = vadd.f32 %v1955_v59, %v1833_v43 }
 0x153   : > { %v695_v32 = vpop.f32.mrf.mxu0 }
 0x154   : > { %1022 = vxpose.xlu1.b32.cont [10/16] %v805_v41, 128 }
 0x155   : > { %v697_v29 = vpop.f32.mrf.mxu0 }
 0x156   : > { %991 = vxpose.xlu0.b32.cont [11/16] %v809_v44, 128  ;;  %v672_v44 = vadd.f32 %v1947_v49, %v1833_v43 }
 0x158   : > { %1023 = vxpose.xlu1.b32.cont [11/16] %v811_v47, 128  ;;  %v699_v47 = vpop.f32.mrf.mxu0 }
 0x15a   : > { %992 = vxpose.xlu0.b32.cont [12/16] %v813_v50, 128  ;;  %v701_v49 = vpop.f32.mrf.mxu0 }
 0x15c   : > { %1024 = vxpose.xlu1.b32.cont [12/16] %v815_v51, 128 }
 0x15e   : > { %993 = vxpose.xlu0.b32.cont [13/16] %v819_v52, 128  ;;  %v2038_v52 = vpop.f32.mrf.mxu1 }
 0x160   : > { %1025 = vxpose.xlu1.b32.cont [13/16] %v821_v56, 128  ;;  %v682_v56 = vadd.f32 %v1964_v7, %v1833_v43  ;;  %v690_v7 = vadd.f32 %v1996_v11, %v1831_v42 }
 0x162   : > { %994 = vxpose.xlu0.b32.cont [14/16] %v823_v61, 128  ;;  %v705_v61 = vpop.f32.mrf.mxu0 }
 0x163   : > { %v706_v11 = vadd.f32 %v705_v61, %v1831_v42  ;;  %v845_v61 = vadd.f32 %v2006_v25, %v1828_v39 }
 0x164   : > { %1026 = vxpose.xlu1.b32.cont [14/16] %v825_v62, 128  ;;  %v2048_v62 = vpop.f32.mrf.mxu1 }
 0x166   : > { %995 = vxpose.xlu0.b32.cont [15/16] %v829_v0, 128  ;;  %v2054_v5 = vpop.f32.mrf.mxu1 }
 0x168   : > { %1027 = vxpose.xlu1.b32.cont [15/16] %v831_v4, 128  ;;  %v707_v4 = vpop.f32.mrf.mxu0 }
 0x16a   : > { %996 = vxpose.xlu0.b32.end [16/16] %v833_v9, 128  ;;  %v933_v54 = vpop.trf.xlu0  ;;  %v709_v14 = vpop.f32.mrf.mxu0 }
 0x16b   : > { %1173 = vst [vmem:[%s1969_s28] sm:$0xff] %v933_v54 }
 0x16c   : > { %1028 = vxpose.xlu1.b32.end [16/16] %v835_v10, 128  ;;  %v965_v57 = vpop.trf.xlu1  ;;  %v692_v10 = vadd.f32 %v2004_v22, %v1833_v43 }
 0x16d   : > { %1205 = vst [vmem:[%s1969_s28 + $0x100] sm:$0xff] %v965_v57  ;;  %v2063_v57 = vpop.f32.mrf.mxu1 }
 0x16e   : > { %1045 = vxpose.xlu0.b32.start [1/16] %v646_v13, 128  ;;  %v934_v60 = vpop.trf.xlu0  ;;  %v696_v13 = vadd.f32 %v695_v32, %v1831_v42 }
 0x16f   : > { %1175 = vst [vmem:[%s1969_s28 + $0x10] sm:$0xff] %v934_v60  ;;  %v698_v60 = vadd.f32 %v697_v29, %v1833_v43 }
 0x170   : > { %1077 = vxpose.xlu1.b32.start [1/16] %v648_v18, 128  ;;  %v966_v20 = vpop.trf.xlu1 }
 0x171   : > { %1207 = vst [vmem:[%s1969_s28 + $0x110] sm:$0xff] %v966_v20  ;;  %v2068_v20 = vpop.f32.mrf.mxu1 }
 0x172   : > { %1046 = vxpose.xlu0.b32.cont [2/16] %v650_v2, 128  ;;  %v935_v23 = vpop.trf.xlu0  ;;  %v711_v2 = vpop.f32.mrf.mxu0 }
 0x173   : > { %1177 = vst [vmem:[%s1969_s28 + $0x20] sm:$0xff] %v935_v23  ;;  %v702_v23 = vadd.f32 %v701_v49, %v1833_v43  ;;  %v839_v49 = vadd.f32 %v1978_v15, %v1826_v37  ;;  %v843_v15 = vadd.f32 %v1998_v16, %v1826_v37  ;;  %v851_v16 = vadd.f32 %v2022_v34, %v1828_v39 }
 0x174   : > { %1078 = vxpose.xlu1.b32.cont [2/16] %v652_v6, 128  ;;  %v967_v17 = vpop.trf.xlu1  ;;  %v700_v6 = vadd.f32 %v699_v47, %v1831_v42 }
 0x175   : > { %1209 = vst [vmem:[%s1969_s28 + $0x120] sm:$0xff] %v967_v17 }
 0x176   : > { %1047 = vxpose.xlu0.b32.cont [3/16] %v656_v12, 128  ;;  %v936_v19 = vpop.trf.xlu0 }
 0x177   : > { %1179 = vst [vmem:[%s1969_s28 + $0x30] sm:$0xff] %v936_v19  ;;  %v2075_v19 = vpop.f32.mrf.mxu1 }
 0x178   : > { %1079 = vxpose.xlu1.b32.cont [3/16] %v658_v21, 128  ;;  %v968_v28 = vpop.trf.xlu1  ;;  %v715_v21 = vpop.f32.mrf.mxu0 }
 0x179   : > { %1211 = vst [vmem:[%s1969_s28 + $0x130] sm:$0xff] %v968_v28 }
 0x17a   : > { %1048 = vxpose.xlu0.b32.cont [4/16] %v660_v26, 128  ;;  %v937_v31 = vpop.trf.xlu0  ;;  %v708_v26 = vadd.f32 %v707_v4, %v1833_v43 }
 0x17b   : > { %1181 = vst [vmem:[%s1969_s28 + $0x40] sm:$0xff] %v937_v31  ;;  %v710_v31 = vadd.f32 %v709_v14, %v1831_v42 }
 0x17c   : > { %1080 = vxpose.xlu1.b32.cont [4/16] %v662_v30, 128  ;;  %v969_v35 = vpop.trf.xlu1  ;;  %v717_v30 = vpop.f32.mrf.mxu0 }
 0x17d   : > { %1213 = vst [vmem:[%s1969_s28 + $0x140] sm:$0xff] %v969_v35  ;;  %v712_v35 = vadd.f32 %v711_v2, %v1833_v43 }
 0x17e   : > { %1049 = vxpose.xlu0.b32.cont [5/16] %v666_v24, 128  ;;  %v938_v36 = vpop.trf.xlu0  ;;  %v2080_v24 = vpop.f32.mrf.mxu1 }
 0x17f   : > { %1183 = vst [vmem:[%s1969_s28 + $0x50] sm:$0xff] %v938_v36  ;;  %v719_v29 = vpop.f32.mrf.mxu0 }
 0x180   : > { %1081 = vxpose.xlu1.b32.cont [5/16] %v668_v27, 128  ;;  %v970_v41 = vpop.trf.xlu1  ;;  %v716_v27 = vadd.f32 %v715_v21, %v1831_v42 }
 0x181   : > { %1215 = vst [vmem:[%s1969_s28 + $0x150] sm:$0xff] %v970_v41 }
 0x182   : > { %1050 = vxpose.xlu0.b32.cont [6/16] %v670_v40, 128  ;;  %v939_v45 = vpop.trf.xlu0  ;;  %v2087_v40 = vpop.f32.mrf.mxu1 }
 0x183   : > { %1185 = vst [vmem:[%s1969_s28 + $0x60] sm:$0xff] %v939_v45  ;;  %v721_v45 = vpop.f32.mrf.mxu0 }
 0x184   : > { %1082 = vxpose.xlu1.b32.cont [6/16] %v672_v44, 128  ;;  %v971_v50 = vpop.trf.xlu1  ;;  %v718_v44 = vadd.f32 %v717_v30, %v1833_v43  ;;  %v2092_v47 = vpop.f32.mrf.mxu1 }
 0x185   : > { %1217 = vst [vmem:[%s1969_s28 + $0x160] sm:$0xff] %v971_v50  ;;  %v720_v50 = vadd.f32 %v719_v29, %v1831_v42  ;;  %v841_v42 = vadd.f32 %v1986_v63, %v1828_v39 }
 0x186   : > { %1051 = vxpose.xlu0.b32.cont [7/16] %v676_v38, 128  ;;  %v940_v51 = vpop.trf.xlu0 }
 0x187   : > { %1187 = vst [vmem:[%s1969_s28 + $0x70] sm:$0xff] %v940_v51  ;;  %v722_v51 = vadd.f32 %v721_v45, %v1833_v43 }
 0x188   : > { %1083 = vxpose.xlu1.b32.cont [7/16] %v678_v46, 128  ;;  %v972_v55 = vpop.trf.xlu1 }
 0x189   : > { %1219 = vst [vmem:[%s1969_s28 + $0x170] sm:$0xff] %v972_v55  ;;  %v2100_v55 = vpop.f32.mrf.mxu1 }
 0x18a   : > { %1052 = vxpose.xlu0.b32.cont [8/16] %v680_v53, 128  ;;  %v941_v59 = vpop.trf.xlu0  ;;  %v879_v21 = vadd.f32 %v2100_v55, %v1826_v37 }
 0x18b   : > { %1189 = vst [vmem:[%s1969_s28 + $0x80] sm:$0xff] %v941_v59  ;;  %v2106_v43 = vpop.f32.mrf.mxu1 }
 0x18c   : > { %1084 = vxpose.xlu1.b32.cont [8/16] %v682_v56, 128  ;;  %v973_v0 = vpop.trf.xlu1 }
 0x18d   : > { %1221 = vst [vmem:[%s1969_s28 + $0x180] sm:$0xff] %v973_v0  ;;  %v849_v0 = vadd.f32 %v2016_v33, %v1826_v37  ;;  %v853_v33 = vadd.f32 %v2032_v48, %v1826_v37  ;;  %v861_v48 = vadd.f32 %v2054_v5, %v1828_v39 }
 0x18e   : > { %1053 = vxpose.xlu0.b32.cont [9/16] %v686_v58, 128  ;;  %v942_v3 = vpop.trf.xlu0 }
 0x18f   : > { %1191 = vst [vmem:[%s1969_s28 + $0x90] sm:$0xff] %v942_v3 }
 0x190   : > { %1085 = vxpose.xlu1.b32.cont [9/16] %v688_v1, 128  ;;  %v974_v9 = vpop.trf.xlu1  ;;  %v2116_v1 = vpop.f32.mrf.mxu1 }
 0x191   : > { %1223 = vst [vmem:[%s1969_s28 + $0x190] sm:$0xff] %v974_v9  ;;  %v855_v9 = vadd.f32 %v2038_v52, %v1828_v39 }
 0x192   : > { %1054 = vxpose.xlu0.b32.cont [10/16] %v690_v7, 128  ;;  %v943_v54 = vpop.trf.xlu0  ;;  %v884_v25 = vpop.f32.mrf.mxu1 }
 0x193   : > { %1193 = vst [vmem:[%s1969_s28 + $0xa0] sm:$0xff] %v943_v54 }
 0x194   : > { %1086 = vxpose.xlu1.b32.cont [10/16] %v692_v10, 128  ;;  %v975_v18 = vpop.trf.xlu1  ;;  %v859_v10 = vadd.f32 %v2048_v62, %v1826_v37  ;;  %v863_v62 = vadd.f32 %v2063_v57, %v1826_v37  ;;  %v871_v57 = vadd.f32 %v2080_v24, %v1828_v39 }
 0x195   : > { %1225 = vst [vmem:[%s1969_s28 + $0x1a0] sm:$0xff] %v975_v18 }
 0x196   : > { %1055 = vxpose.xlu0.b32.cont [11/16] %v696_v13, 128  ;;  %v944_v8 = vpop.trf.xlu0  ;;  %v888_v13 = vpop.f32.mrf.mxu1 }
 0x197   : > { %1195 = vst [vmem:[%s1969_s28 + $0xb0] sm:$0xff] %v944_v8  ;;  %v869_v8 = vadd.f32 %v2075_v19, %v1826_v37 }
 0x198   : > { %1087 = vxpose.xlu1.b32.cont [11/16] %v698_v60, 128  ;;  %v976_v12 = vpop.trf.xlu1  ;;  %v890_v52 = vpop.f32.mrf.mxu1  ;;  %v865_v60 = vadd.f32 %v2068_v20, %v1828_v39 }
 0x199   : > { %1227 = vst [vmem:[%s1969_s28 + $0x1b0] sm:$0xff] %v976_v12 }
 0x19a   : > { %1056 = vxpose.xlu0.b32.cont [12/16] %v700_v6, 128  ;;  %v945_v17 = vpop.trf.xlu0  ;;  %v892_v2 = vpop.f32.mrf.mxu1 }
 0x19b   : > { %1197 = vst [vmem:[%s1969_s28 + $0xc0] sm:$0xff] %v945_v17  ;;  %v875_v17 = vadd.f32 %v2092_v47, %v1828_v39  ;;  %v893_v45 = vadd.f32 %v892_v2, %v1826_v37 }
 0x19c   : > { %1088 = vxpose.xlu1.b32.cont [12/16] %v702_v23, 128  ;;  %v977_v22 = vpop.trf.xlu1  ;;  %v894_v20 = vpop.f32.mrf.mxu1  ;;  %v873_v23 = vadd.f32 %v2087_v40, %v1826_v37 }
 0x19d   : > { %1229 = vst [vmem:[%s1969_s28 + $0x1c0] sm:$0xff] %v977_v22 }
 0x19e   : > { %1057 = vxpose.xlu0.b32.cont [13/16] %v706_v11, 128  ;;  %v946_v28 = vpop.trf.xlu0  ;;  %v898_v22 = vpop.f32.mrf.mxu1 }
 0x19f   : > { %1199 = vst [vmem:[%s1969_s28 + $0xd0] sm:$0xff] %v946_v28  ;;  %v881_v28 = vadd.f32 %v2106_v43, %v1828_v39 }
 0x1a0   : > { %1089 = vxpose.xlu1.b32.cont [13/16] %v708_v26, 128  ;;  %v978_v32 = vpop.trf.xlu1  ;;  %v900_v24 = vpop.f32.mrf.mxu1 }
 0x1a1   : > { %1231 = vst [vmem:[%s1969_s28 + $0x1d0] sm:$0xff] %v978_v32  ;;  %v901_v55 = vadd.f32 %v900_v24, %v1828_v39 }
 0x1a2   : > { %1058 = vxpose.xlu0.b32.cont [14/16] %v710_v31, 128  ;;  %v947_v36 = vpop.trf.xlu0  ;;  %v883_v31 = vadd.f32 %v2116_v1, %v1826_v37  ;;  %v902_v29 = vpop.f32.mrf.mxu1 }
 0x1a3   : > { %1201 = vst [vmem:[%s1969_s28 + $0xe0] sm:$0xff] %v947_v36 }
 0x1a4   : > { %1090 = vxpose.xlu1.b32.cont [14/16] %v712_v35, 128  ;;  %v979_v41 = vpop.trf.xlu1  ;;  %v885_v35 = vadd.f32 %v884_v25, %v1828_v39 }
 0x1a5   : > { %1233 = vst [vmem:[%s1969_s28 + $0x1e0] sm:$0xff] %v979_v41  ;;  %v891_v41 = vadd.f32 %v890_v52, %v1828_v39 }
 0x1a6   : > { %1059 = vxpose.xlu0.b32.cont [15/16] %v716_v27, 128  ;;  %v948_v38 = vpop.trf.xlu0  ;;  %v889_v27 = vadd.f32 %v888_v13, %v1826_v37 }
 0x1a7   : > { %1203 = vst [vmem:[%s1969_s28 + $0xf0] sm:$0xff] %v948_v38  ;;  %v904_v38 = vpop.f32.mrf.mxu1 }
 0x1a8   : > { %1091 = vxpose.xlu1.b32.cont [15/16] %v718_v44, 128  ;;  %v980_v46 = vpop.trf.xlu1 }
 0x1a9   : > { %1235 = vst [vmem:[%s1969_s28 + $0x1f0] sm:$0xff] %v980_v46  ;;  %v899_v46 = vadd.f32 %v898_v22, %v1826_v37 }
 0x1aa   : > { %1060 = vxpose.xlu0.b32.end [16/16] %v720_v50, 128  ;;  %v997_v53 = vpop.trf.xlu0  ;;  %v895_v50 = vadd.f32 %v894_v20, %v1828_v39 }
 0x1ab   : > { %1237 = vst [vmem:[%s1969_s28 + $0x200] sm:$0xff] %v997_v53 }
 0x1ac   : > { %1092 = vxpose.xlu1.b32.end [16/16] %v722_v51, 128  ;;  %v1029_v56 = vpop.trf.xlu1 }
 0x1ad   : > { %1269 = vst [vmem:[%s1969_s28 + $0x300] sm:$0xff] %v1029_v56 }
 0x1ae   : > { %1109 = vxpose.xlu0.b32.start [1/16] %v839_v49, 128  ;;  %v998_v58 = vpop.trf.xlu0  ;;  %v908_v49 = vpop.f32.mrf.mxu1 }
 0x1af   : > { %1239 = vst [vmem:[%s1969_s28 + $0x210] sm:$0xff] %v998_v58  ;;  %v903_v58 = vadd.f32 %v902_v29, %v1826_v37 }
 0x1b0   : > { %1141 = vxpose.xlu1.b32.start [1/16] %v841_v42, 128  ;;  %v1030_v59 = vpop.trf.xlu1  ;;  %v910_v42 = vpop.f32.mrf.mxu1 }
 0x1b1   : > { %1271 = vst [vmem:[%s1969_s28 + $0x310] sm:$0xff] %v1030_v59  ;;  %v909_v59 = vadd.f32 %v908_v49, %v1826_v37  ;;  %v911_v1 = vadd.f32 %v910_v42, %v1828_v39 }
 0x1b2   : > { %1110 = vxpose.xlu0.b32.cont [2/16] %v843_v15, 128  ;;  %v999_v63 = vpop.trf.xlu0  ;;  %v905_v15 = vadd.f32 %v904_v38, %v1828_v39 }
 0x1b3   : > { %1241 = vst [vmem:[%s1969_s28 + $0x220] sm:$0xff] %v999_v63 }
 0x1b4   : > { %1142 = vxpose.xlu1.b32.cont [2/16] %v845_v61, 128  ;;  %v1031_v3 = vpop.trf.xlu1 }
 0x1b5   : > { %1273 = vst [vmem:[%s1969_s28 + $0x320] sm:$0xff] %v1031_v3 }
 0x1b6   : > { %1111 = vxpose.xlu0.b32.cont [3/16] %v849_v0, 128  ;;  %v1000_v4 = vpop.trf.xlu0  ;;  %v912_v0 = vpop.f32.mrf.mxu1 }
 0x1b7   : > { %1243 = vst [vmem:[%s1969_s28 + $0x230] sm:$0xff] %v1000_v4  ;;  %v913_v4 = vadd.f32 %v912_v0, %v1826_v37 }
 0x1b8   : > { %1143 = vxpose.xlu1.b32.cont [3/16] %v851_v16, 128  ;;  %v1032_v7 = vpop.trf.xlu1  ;;  %v914_v16 = vpop.f32.mrf.mxu1 }
 0x1b9   : > { %1275 = vst [vmem:[%s1969_s28 + $0x330] sm:$0xff] %v1032_v7 }
 0x1ba   : > { %1112 = vxpose.xlu0.b32.cont [4/16] %v853_v33, 128  ;;  %v1001_v34 = vpop.trf.xlu0  ;;  %v915_v33 = vadd.f32 %v914_v16, %v1828_v39 }
 0x1bb   : > { %1245 = vst [vmem:[%s1969_s28 + $0x240] sm:$0xff] %v1001_v34 }
 0x1bc   : > { %1144 = vxpose.xlu1.b32.cont [4/16] %v855_v9, 128  ;;  %v1033_v54 = vpop.trf.xlu1 }
 0x1bd   : > { %1277 = vst [vmem:[%s1969_s28 + $0x340] sm:$0xff] %v1033_v54 }
 0x1be   : > { %1113 = vxpose.xlu0.b32.cont [5/16] %v859_v10, 128  ;;  %v1002_v14 = vpop.trf.xlu0 }
 0x1bf   : > { %1247 = vst [vmem:[%s1969_s28 + $0x250] sm:$0xff] %v1002_v14 }
 0x1c0   : > { %1145 = vxpose.xlu1.b32.cont [5/16] %v861_v48, 128  ;;  %v1034_v18 = vpop.trf.xlu1 }
 0x1c1   : > { %1279 = vst [vmem:[%s1969_s28 + $0x350] sm:$0xff] %v1034_v18 }
 0x1c2   : > { %1114 = vxpose.xlu0.b32.cont [6/16] %v863_v62, 128  ;;  %v1003_v5 = vpop.trf.xlu0 }
 0x1c3   : > { %1249 = vst [vmem:[%s1969_s28 + $0x260] sm:$0xff] %v1003_v5 }
 0x1c4   : > { %1146 = vxpose.xlu1.b32.cont [6/16] %v865_v60, 128  ;;  %v1035_v6 = vpop.trf.xlu1 }
 0x1c5   : > { %1281 = vst [vmem:[%s1969_s28 + $0x360] sm:$0xff] %v1035_v6 }
 0x1c6   : > { %1115 = vxpose.xlu0.b32.cont [7/16] %v869_v8, 128  ;;  %v1004_v12 = vpop.trf.xlu0 }
 0x1c7   : > { %1251 = vst [vmem:[%s1969_s28 + $0x270] sm:$0xff] %v1004_v12 }
 0x1c8   : > { %1147 = vxpose.xlu1.b32.cont [7/16] %v871_v57, 128  ;;  %v1036_v11 = vpop.trf.xlu1 }
 0x1c9   : > { %1283 = vst [vmem:[%s1969_s28 + $0x370] sm:$0xff] %v1036_v11 }
 0x1ca   : > { %1116 = vxpose.xlu0.b32.cont [8/16] %v873_v23, 128  ;;  %v1005_v19 = vpop.trf.xlu0 }
 0x1cb   : > { %1253 = vst [vmem:[%s1969_s28 + $0x280] sm:$0xff] %v1005_v19 }
 0x1cc   : > { %1148 = vxpose.xlu1.b32.cont [8/16] %v875_v17, 128  ;;  %v1037_v26 = vpop.trf.xlu1 }
 0x1cd   : > { %1285 = vst [vmem:[%s1969_s28 + $0x380] sm:$0xff] %v1037_v26 }
 0x1ce   : > { %1117 = vxpose.xlu0.b32.cont [9/16] %v879_v21, 128  ;;  %v1006_v30 = vpop.trf.xlu0 }
 0x1cf   : > { %1255 = vst [vmem:[%s1969_s28 + $0x290] sm:$0xff] %v1006_v30 }
 0x1d0   : > { %1149 = vxpose.xlu1.b32.cont [9/16] %v881_v28, 128  ;;  %v1038_v32 = vpop.trf.xlu1 }
 0x1d1   : > { %1287 = vst [vmem:[%s1969_s28 + $0x390] sm:$0xff] %v1038_v32 }
 0x1d2   : > { %1118 = vxpose.xlu0.b32.cont [10/16] %v883_v31, 128  ;;  %v1007_v36 = vpop.trf.xlu0 }
 0x1d3   : > { %1257 = vst [vmem:[%s1969_s28 + $0x2a0] sm:$0xff] %v1007_v36 }
 0x1d4   : > { %1150 = vxpose.xlu1.b32.cont [10/16] %v885_v35, 128  ;;  %v1039_v40 = vpop.trf.xlu1 }
 0x1d5   : > { %1289 = vst [vmem:[%s1969_s28 + $0x3a0] sm:$0xff] %v1039_v40 }
 0x1d6   : > { %1119 = vxpose.xlu0.b32.cont [11/16] %v889_v27, 128  ;;  %v1008_v44 = vpop.trf.xlu0 }
 0x1d7   : > { %1259 = vst [vmem:[%s1969_s28 + $0x2b0] sm:$0xff] %v1008_v44 }
 0x1d8   : > { %1151 = vxpose.xlu1.b32.cont [11/16] %v891_v41, 128  ;;  %v1040_v47 = vpop.trf.xlu1 }
 0x1d9   : > { %1291 = vst [vmem:[%s1969_s28 + $0x3b0] sm:$0xff] %v1040_v47 }
 0x1da   : > { %1120 = vxpose.xlu0.b32.cont [12/16] %v893_v45, 128  ;;  %v1009_v51 = vpop.trf.xlu0 }
 0x1db   : > { %1261 = vst [vmem:[%s1969_s28 + $0x2c0] sm:$0xff] %v1009_v51 }
 0x1dc   : > { %1152 = vxpose.xlu1.b32.cont [12/16] %v895_v50, 128  ;;  %v1041_v53 = vpop.trf.xlu1 }
 0x1dd   : > { %1293 = vst [vmem:[%s1969_s28 + $0x3c0] sm:$0xff] %v1041_v53 }
 0x1de   : > { %1121 = vxpose.xlu0.b32.cont [13/16] %v899_v46, 128  ;;  %v1010_v56 = vpop.trf.xlu0 }
 0x1df   : > { %1263 = vst [vmem:[%s1969_s28 + $0x2d0] sm:$0xff] %v1010_v56 }
 0x1e0   : > { %1153 = vxpose.xlu1.b32.cont [13/16] %v901_v55, 128  ;;  %v1042_v43 = vpop.trf.xlu1 }
 0x1e1   : > { %1295 = vst [vmem:[%s1969_s28 + $0x3d0] sm:$0xff] %v1042_v43 }
 0x1e2   : > { %1122 = vxpose.xlu0.b32.cont [14/16] %v903_v58, 128  ;;  %v1011_v61 = vpop.trf.xlu0 }
 0x1e3   : > { %1265 = vst [vmem:[%s1969_s28 + $0x2e0] sm:$0xff] %v1011_v61 }
 0x1e4   : > { %1154 = vxpose.xlu1.b32.cont [14/16] %v905_v15, 128  ;;  %v1043_v63 = vpop.trf.xlu1 }
 0x1e5   : > { %1297 = vst [vmem:[%s1969_s28 + $0x3e0] sm:$0xff] %v1043_v63 }
 0x1e6   : > { %1123 = vxpose.xlu0.b32.cont [15/16] %v909_v59, 128  ;;  %v1012_v3 = vpop.trf.xlu0 }
 0x1e7   : > { %1267 = vst [vmem:[%s1969_s28 + $0x2f0] sm:$0xff] %v1012_v3 }
 0x1e8   : > { %1155 = vxpose.xlu1.b32.cont [15/16] %v911_v1, 128  ;;  %v1044_v25 = vpop.trf.xlu1 }
 0x1e9   : > { %1299 = vst [vmem:[%s1969_s28 + $0x3f0] sm:$0xff] %v1044_v25 }
 0x1ea   : > { %1124 = vxpose.xlu0.b32.end [16/16] %v913_v4, 128  ;;  %v1061_v7 = vpop.trf.xlu0 }
 0x1eb   : > { %1174 = vst [vmem:[%s1969_s28 + $0x8] sm:$0xff] %v1061_v7 }
 0x1ec   : > { %1156 = vxpose.xlu1.b32.end [16/16] %v915_v33, 128  ;;  %v1093_v9 = vpop.trf.xlu1 }
 0x1ed   : > { %1206 = vst [vmem:[%s1969_s28 + $0x108] sm:$0xff] %v1093_v9 }
 0x1ee   : > { %v1062_v10 = vpop.trf.xlu0 }
 0x1ef   : > { %1176 = vst [vmem:[%s1969_s28 + $0x18] sm:$0xff] %v1062_v10 }
 0x1f0   : > { %v1094_v37 = vpop.trf.xlu1 }
 0x1f1   : > { %1208 = vst [vmem:[%s1969_s28 + $0x118] sm:$0xff] %v1094_v37 }
 0x1f2   : > { %v1063_v34 = vpop.trf.xlu0 }
 0x1f3   : > { %1178 = vst [vmem:[%s1969_s28 + $0x28] sm:$0xff] %v1063_v34 }
 0x1f4   : > { %v1095_v39 = vpop.trf.xlu1 }
 0x1f5   : > { %1210 = vst [vmem:[%s1969_s28 + $0x128] sm:$0xff] %v1095_v39 }
 0x1f6   : > { %v1064_v13 = vpop.trf.xlu0 }
 0x1f7   : > { %1180 = vst [vmem:[%s1969_s28 + $0x38] sm:$0xff] %v1064_v13 }
 0x1f8   : > { %v1096_v54 = vpop.trf.xlu1 }
 0x1f9   : > { %1212 = vst [vmem:[%s1969_s28 + $0x138] sm:$0xff] %v1096_v54 }
 0x1fa   : > { %v1065_v48 = vpop.trf.xlu0 }
 0x1fb   : > { %1182 = vst [vmem:[%s1969_s28 + $0x48] sm:$0xff] %v1065_v48 }
 0x1fc   : > { %v1097_v14 = vpop.trf.xlu1 }
 0x1fd   : > { %1214 = vst [vmem:[%s1969_s28 + $0x148] sm:$0xff] %v1097_v14 }
 0x1fe   : > { %v1066_v52 = vpop.trf.xlu0 }
 0x1ff   : > { %1184 = vst [vmem:[%s1969_s28 + $0x58] sm:$0xff] %v1066_v52 }
 0x200   : > { %v1098_v62 = vpop.trf.xlu1 }
 0x201   : > { %1216 = vst [vmem:[%s1969_s28 + $0x158] sm:$0xff] %v1098_v62 }
 0x202   : > { %v1067_v18 = vpop.trf.xlu0 }
 0x203   : > { %1186 = vst [vmem:[%s1969_s28 + $0x68] sm:$0xff] %v1067_v18 }
 0x204   : > { %v1099_v60 = vpop.trf.xlu1 }
 0x205   : > { %1218 = vst [vmem:[%s1969_s28 + $0x168] sm:$0xff] %v1099_v60 }
 0x206   : > { %v1068_v8 = vpop.trf.xlu0 }
 0x207   : > { %1188 = vst [vmem:[%s1969_s28 + $0x78] sm:$0xff] %v1068_v8 }
 0x208   : > { %v1100_v5 = vpop.trf.xlu1 }
 0x209   : > { %1220 = vst [vmem:[%s1969_s28 + $0x178] sm:$0xff] %v1100_v5 }
 0x20a   : > { %v1069_v2 = vpop.trf.xlu0 }
 0x20b   : > { %1190 = vst [vmem:[%s1969_s28 + $0x88] sm:$0xff] %v1069_v2 }
 0x20c   : > { %v1101_v6 = vpop.trf.xlu1 }
 0x20d   : > { %1222 = vst [vmem:[%s1969_s28 + $0x188] sm:$0xff] %v1101_v6 }
 0x20e   : > { %v1070_v57 = vpop.trf.xlu0 }
 0x20f   : > { %1192 = vst [vmem:[%s1969_s28 + $0x98] sm:$0xff] %v1070_v57 }
 0x210   : > { %v1102_v12 = vpop.trf.xlu1 }
 0x211   : > { %1224 = vst [vmem:[%s1969_s28 + $0x198] sm:$0xff] %v1102_v12 }
 0x212   : > { %v1071_v20 = vpop.trf.xlu0 }
 0x213   : > { %1194 = vst [vmem:[%s1969_s28 + $0xa8] sm:$0xff] %v1071_v20 }
 0x214   : > { %v1103_v23 = vpop.trf.xlu1 }
 0x215   : > { %1226 = vst [vmem:[%s1969_s28 + $0x1a8] sm:$0xff] %v1103_v23 }
 0x216   : > { %v1072_v11 = vpop.trf.xlu0 }
 0x217   : > { %1196 = vst [vmem:[%s1969_s28 + $0xb8] sm:$0xff] %v1072_v11 }
 0x218   : > { %v1104_v17 = vpop.trf.xlu1 }
 0x219   : > { %1228 = vst [vmem:[%s1969_s28 + $0x1b8] sm:$0xff] %v1104_v17 }
 0x21a   : > { %v1073_v21 = vpop.trf.xlu0 }
 0x21b   : > { %1198 = vst [vmem:[%s1969_s28 + $0xc8] sm:$0xff] %v1073_v21 }
 0x21c   : > { %v1105_v19 = vpop.trf.xlu1 }
 0x21d   : > { %1230 = vst [vmem:[%s1969_s28 + $0x1c8] sm:$0xff] %v1105_v19 }
 0x21e   : > { %v1074_v22 = vpop.trf.xlu0 }
 0x21f   : > { %1200 = vst [vmem:[%s1969_s28 + $0xd8] sm:$0xff] %v1074_v22 }
 0x220   : > { %v1106_v26 = vpop.trf.xlu1 }
 0x221   : > { %1232 = vst [vmem:[%s1969_s28 + $0x1d8] sm:$0xff] %v1106_v26 }
 0x222   : > { %v1075_v28 = vpop.trf.xlu0 }
 0x223   : > { %1202 = vst [vmem:[%s1969_s28 + $0xe8] sm:$0xff] %v1075_v28 }
 0x224   : > { %v1107_v30 = vpop.trf.xlu1 }
 0x225   : > { %1234 = vst [vmem:[%s1969_s28 + $0x1e8] sm:$0xff] %v1107_v30 }
 0x226   : > { %v1076_v24 = vpop.trf.xlu0 }
 0x227   : > { %1204 = vst [vmem:[%s1969_s28 + $0xf8] sm:$0xff] %v1076_v24 }
 0x228   : > { %v1108_v31 = vpop.trf.xlu1 }
 0x229   : > { %1236 = vst [vmem:[%s1969_s28 + $0x1f8] sm:$0xff] %v1108_v31 }
 0x22a   : > { %v1125_v32 = vpop.trf.xlu0 }
 0x22b   : > { %1238 = vst [vmem:[%s1969_s28 + $0x208] sm:$0xff] %v1125_v32 }
 0x22c   : > { %v1157_v35 = vpop.trf.xlu1 }
 0x22d   : > { %1270 = vst [vmem:[%s1969_s28 + $0x308] sm:$0xff] %v1157_v35 }
 0x22e   : > { %v1126_v27 = vpop.trf.xlu0 }
 0x22f   : > { %1240 = vst [vmem:[%s1969_s28 + $0x218] sm:$0xff] %v1126_v27 }
 0x230   : > { %v1158_v36 = vpop.trf.xlu1 }
 0x231   : > { %1272 = vst [vmem:[%s1969_s28 + $0x318] sm:$0xff] %v1158_v36 }
 0x232   : > { %v1127_v29 = vpop.trf.xlu0 }
 0x233   : > { %1242 = vst [vmem:[%s1969_s28 + $0x228] sm:$0xff] %v1127_v29 }
 0x234   : > { %v1159_v40 = vpop.trf.xlu1 }
 0x235   : > { %1274 = vst [vmem:[%s1969_s28 + $0x328] sm:$0xff] %v1159_v40 }
 0x236   : > { %v1128_v41 = vpop.trf.xlu0 }
 0x237   : > { %1244 = vst [vmem:[%s1969_s28 + $0x238] sm:$0xff] %v1128_v41 }
 0x238   : > { %v1160_v44 = vpop.trf.xlu1 }
 0x239   : > { %1276 = vst [vmem:[%s1969_s28 + $0x338] sm:$0xff] %v1160_v44 }
 0x23a   : > { %v1129_v38 = vpop.trf.xlu0 }
 0x23b   : > { %1246 = vst [vmem:[%s1969_s28 + $0x248] sm:$0xff] %v1129_v38 }
 0x23c   : > { %v1161_v45 = vpop.trf.xlu1 }
 0x23d   : > { %1278 = vst [vmem:[%s1969_s28 + $0x348] sm:$0xff] %v1161_v45 }
 0x23e   : > { %v1130_v47 = vpop.trf.xlu0 }
 0x23f   : > { %1248 = vst [vmem:[%s1969_s28 + $0x258] sm:$0xff] %v1130_v47 }
 0x240   : > { %v1162_v50 = vpop.trf.xlu1 }
 0x241   : > { %1280 = vst [vmem:[%s1969_s28 + $0x358] sm:$0xff] %v1162_v50 }
 0x242   : > { %v1131_v46 = vpop.trf.xlu0 }
 0x243   : > { %1250 = vst [vmem:[%s1969_s28 + $0x268] sm:$0xff] %v1131_v46 }
 0x244   : > { %v1163_v51 = vpop.trf.xlu1 }
 0x245   : > { %1282 = vst [vmem:[%s1969_s28 + $0x368] sm:$0xff] %v1163_v51 }
 0x246   : > { %v1132_v49 = vpop.trf.xlu0 }
 0x247   : > { %1252 = vst [vmem:[%s1969_s28 + $0x278] sm:$0xff] %v1132_v49 }
 0x248   : > { %v1164_v53 = vpop.trf.xlu1 }
 0x249   : > { %1284 = vst [vmem:[%s1969_s28 + $0x378] sm:$0xff] %v1164_v53 }
 0x24a   : > { %v1133_v55 = vpop.trf.xlu0 }
 0x24b   : > { %1254 = vst [vmem:[%s1969_s28 + $0x288] sm:$0xff] %v1133_v55 }
 0x24c   : > { %v1165_v56 = vpop.trf.xlu1 }
 0x24d   : > { %1286 = vst [vmem:[%s1969_s28 + $0x388] sm:$0xff] %v1165_v56 }
 0x24e   : > { %v1134_v42 = vpop.trf.xlu0 }
 0x24f   : > { %1256 = vst [vmem:[%s1969_s28 + $0x298] sm:$0xff] %v1134_v42 }
 0x250   : > { %v1166_v58 = vpop.trf.xlu1 }
 0x251   : > { %1288 = vst [vmem:[%s1969_s28 + $0x398] sm:$0xff] %v1166_v58 }
 0x252   : > { %v1135_v43 = vpop.trf.xlu0 }
 0x253   : > { %1258 = vst [vmem:[%s1969_s28 + $0x2a8] sm:$0xff] %v1135_v43 }
 0x254   : > { %v1167_v15 = vpop.trf.xlu1 }
 0x255   : > { %1290 = vst [vmem:[%s1969_s28 + $0x3a8] sm:$0xff] %v1167_v15 }
 0x256   : > { %v1136_v59 = vpop.trf.xlu0 }
 0x257   : > { %1260 = vst [vmem:[%s1969_s28 + $0x2b8] sm:$0xff] %v1136_v59 }
 0x258   : > { %v1168_v61 = vpop.trf.xlu1 }
 0x259   : > { %1292 = vst [vmem:[%s1969_s28 + $0x3b8] sm:$0xff] %v1168_v61 }
 0x25a   : > { %v1137_v0 = vpop.trf.xlu0 }
 0x25b   : > { %1262 = vst [vmem:[%s1969_s28 + $0x2c8] sm:$0xff] %v1137_v0 }
 0x25c   : > { %v1169_v63 = vpop.trf.xlu1 }
 0x25d   : > { %1294 = vst [vmem:[%s1969_s28 + $0x3c8] sm:$0xff] %v1169_v63 }
 0x25e   : > { %v1138_v1 = vpop.trf.xlu0 }
 0x25f   : > { %1264 = vst [vmem:[%s1969_s28 + $0x2d8] sm:$0xff] %v1138_v1 }
 0x260   : > { %v1170_v3 = vpop.trf.xlu1 }
 0x261   : > { %1296 = vst [vmem:[%s1969_s28 + $0x3d8] sm:$0xff] %v1170_v3 }
 0x262   : > { %v1139_v16 = vpop.trf.xlu0 }
 0x263   : > { %1266 = vst [vmem:[%s1969_s28 + $0x2e8] sm:$0xff] %v1139_v16 }
 0x264   : > { %v1171_v4 = vpop.trf.xlu1 }
 0x265   : > { %1298 = vst [vmem:[%s1969_s28 + $0x3e8] sm:$0xff] %v1171_v4 }
 0x266   : > { %v1140_v25 = vpop.trf.xlu0 }
 0x267   : > { %1268 = vst [vmem:[%s1969_s28 + $0x2f8] sm:$0xff] %v1140_v25 }
 0x268   : > { %v1172_v33 = vpop.trf.xlu1 }
 0x269   : > { %1300 = vst [vmem:[%s1969_s28 + $0x3f8] sm:$0xff] %v1172_v33 }
 0x26a PF: > { %s14_s14 = sadd.s32 1, %s1637_s14   ;;  %s2265_s12 = smov %s1633_s13 }
 0x26b   : > { %p11_p2 = scmp.ge.s32.totalorder %s14_s14, 4   ;;  %s2266_s13 = smov %s2268_s16 }
 0x26d   :  { %13 = sbr.rel (!%p11_p2) target bundleno = 2 (0x2), region = 71 }
 0x272   :  { %1342 = vsyncpa [#allocation3], 1 }
 0x273   :  { %1344 = vsyncpa [#allocation3 + $0x1], 1 }

</bundles_post_ra>
